<compile_context>
chip_gen: v6e
topology: v6e:2x2x1
jax: 0.10.0
libtpu: 0.0.40
codegen_flags: <defaults>
</compile_context>

<pallas_src>
import functools
import math

import jax
import jax.numpy as jnp
from jax import lax
from jax.experimental import pallas as pl
from jax.experimental.pallas import tpu as pltpu


# ----------------------------- tiling helpers -----------------------------
def _pick_seq_tile(S):
    # Biggest 128-multiple tile that divides S; else take the whole (small) S.
    for tm in (512, 256, 128):
        if S % tm == 0:
            return tm
    return S


def _pick_head_group(num_heads, head_dim):
    # Prefer lane-dense head groups (hg * d a multiple of 128); fall back to
    # all heads (block width == H, always a legal full-dim block).
    for lanes in (512, 256, 128):
        if lanes % head_dim == 0:
            hg = lanes // head_dim
            if 0 < hg <= num_heads and num_heads % hg == 0:
                return hg
    return num_heads


# ----------------------------- Kernel 1: fused QKV projection -----------------------------
def _qkv_proj_kernel(x_ref, w_ref, b_ref, q_ref, k_ref, v_ref, *,
                     hidden, compute_dtype):
    # x block: (1, tm, H); w: (H, 3H) bf16; b: (1, 3H) f32; outputs: (1, tm, H)
    x = x_ref[0].astype(compute_dtype)                                  # (tm, H)
    y = jnp.dot(x, w_ref[...], preferred_element_type=jnp.float32)      # (tm, 3H) f32
    y = y + b_ref[...]                                                   # f32 bias add
    q_ref[0] = y[:, :hidden].astype(q_ref.dtype)
    k_ref[0] = y[:, hidden:2 * hidden].astype(k_ref.dtype)
    v_ref[0] = y[:, 2 * hidden:].astype(v_ref.dtype)


def qkv_projection(x, w_qkv, b_qkv, *, compute_dtype=jnp.bfloat16):
    B, S, H = x.shape
    tm = _pick_seq_tile(S)
    out_sds = jax.ShapeDtypeStruct((B, S, H), compute_dtype)
    x_spec = pl.BlockSpec((1, tm, H), lambda b, s: (b, s, 0))
    w_spec = pl.BlockSpec((H, 3 * H), lambda b, s: (0, 0))
    b_spec = pl.BlockSpec((1, 3 * H), lambda b, s: (0, 0))
    o_spec = pl.BlockSpec((1, tm, H), lambda b, s: (b, s, 0))
    kernel = functools.partial(_qkv_proj_kernel, hidden=H,
                               compute_dtype=compute_dtype)
    return pl.pallas_call(
        kernel,
        out_shape=(out_sds, out_sds, out_sds),
        grid_spec=pltpu.PrefetchScalarGridSpec(
            num_scalar_prefetch=0,
            grid=(B, S // tm),
            in_specs=[x_spec, w_spec, b_spec],
            out_specs=[o_spec, o_spec, o_spec],
        ),
        compiler_params=pltpu.CompilerParams(
            dimension_semantics=("parallel", "parallel")),
    )(x, w_qkv, b_qkv)


# ----------------------------- Kernel 2: grouped multi-head attention -----------------------------
def _attention_kernel(q_ref, k_ref, v_ref, mask_ref, o_ref, *,
                      heads_per_step, head_dim, scale):
    # q/k/v blocks: (1, S, hg*d) bf16 in [B, S, H] layout; mask: (1, 1, 1, S) f32;
    # output block: (1, S, hg*d) f32 written directly into the [B, S, H] context.
    mask = mask_ref[0, 0]                       # (1, S), broadcasts over query rows
    q = q_ref[0]                                # (S, hg*d)
    k = k_ref[0]
    v = v_ref[0]
    ctxs = []
    for h in range(heads_per_step):             # static per-head loop within group
        lo, hi = h * head_dim, (h + 1) * head_dim
        qh, kh, vh = q[:, lo:hi], k[:, lo:hi], v[:, lo:hi]
        # QK^T contracting on d (no K transpose materialized), f32 accumulation.
        scores = lax.dot_general(qh, kh, (((1,), (1,)), ((), ())),
                                 preferred_element_type=jnp.float32)     # (S, S)
        scores = scores * scale + mask
        # numerically-stable softmax in f32
        scores = scores - jnp.max(scores, axis=-1, keepdims=True)
        e = jnp.exp(scores)
        denom = jnp.sum(e, axis=-1, keepdims=True)
        probs = e * pl.reciprocal(denom, approx=True)
        # dropout: identity (eval mode); head_mask: None.
        ctxs.append(jnp.dot(probs.astype(vh.dtype), vh,
                            preferred_element_type=jnp.float32))          # (S, d)
    # single lane-dense store of the whole head group
    o_ref[0] = jnp.concatenate(ctxs, axis=-1).astype(o_ref.dtype)


def multihead_attention(q, k, v, attention_mask, num_heads, head_dim):
    # q, k, v: [B, S, H] (mixed layout, heads contiguous along H); mask: [B, 1, 1, S]
    B, S, H = q.shape
    hg = _pick_head_group(num_heads, head_dim)
    G = num_heads // hg
    gw = hg * head_dim                                  # group lane width
    scale = 1.0 / math.sqrt(head_dim)
    qkv_spec = pl.BlockSpec((1, S, gw), lambda b, g: (b, 0, g))
    mask_spec = pl.BlockSpec((1, 1, 1, S), lambda b, g: (b, 0, 0, 0))
    o_spec = pl.BlockSpec((1, S, gw), lambda b, g: (b, 0, g))
    kernel = functools.partial(_attention_kernel, heads_per_step=hg,
                               head_dim=head_dim, scale=scale)
    # TODO(synk): for S >~ 1k (esp. v7x 64 MiB VMEM), switch to a flash-style
    # KV-tiled grid axis with online-softmax scratch instead of a full (S, S)
    # scores tile.
    return pl.pallas_call(
        kernel,
        out_shape=jax.ShapeDtypeStruct((B, S, H), jnp.float32),
        grid_spec=pltpu.PrefetchScalarGridSpec(
            num_scalar_prefetch=0,
            grid=(B, G),
            in_specs=[qkv_spec, qkv_spec, qkv_spec, mask_spec],
            out_specs=o_spec,
        ),
        compiler_params=pltpu.CompilerParams(
            dimension_semantics=("parallel", "parallel")),
    )(q, k, v, attention_mask)


# ----------------------------- Full module forward -----------------------------
def prepare_params(params, compute_dtype=jnp.bfloat16):
    """One-time weight prep (outside the forward): fuse + transpose + cast."""
    w_qkv = jnp.concatenate(
        [params["wq"].T, params["wk"].T, params["wv"].T], axis=1)   # [H, 3H], [in, out]
    b_qkv = jnp.concatenate(
        [params["bq"], params["bk"], params["bv"]]).reshape(1, -1)  # [1, 3H]
    return {"w_qkv": w_qkv.astype(compute_dtype),
            "b_qkv": b_qkv.astype(jnp.float32)}


def bert_self_attention(hidden_states, attention_mask, prepared,
                        num_attention_heads, compute_dtype=jnp.bfloat16):
    B, S, H = hidden_states.shape
    assert H % num_attention_heads == 0
    head_dim = H // num_attention_heads
    # Fused QKV projection (single MXU matmul per step); Q/K/V stay [B, S, H].
    q, k, v = qkv_projection(hidden_states, prepared["w_qkv"], prepared["b_qkv"],
                             compute_dtype=compute_dtype)
    # Attention reads head-group column blocks and writes context straight
    # into [B, S, H] — no split/merge transposes anywhere.
    return multihead_attention(q, k, v, attention_mask,
                               num_attention_heads, head_dim)


# ----------------------------- Reference (pure JAX, f32) -----------------------------
def reference_forward(hidden_states, attention_mask, params, num_heads):
    B, S, H = hidden_states.shape
    d = H // num_heads
    q = hidden_states @ params["wq"].T + params["bq"]
    k = hidden_states @ params["wk"].T + params["bk"]
    v = hidden_states @ params["wv"].T + params["bv"]
    sh = lambda x: x.reshape(B, S, num_heads, d).transpose(0, 2, 1, 3)
    ql, kl, vl = sh(q), sh(k), sh(v)
    scores = jnp.einsum("bhqd,bhkd->bhqk", ql, kl) / math.sqrt(d)
    scores = scores + attention_mask
    probs = jax.nn.softmax(scores, axis=-1)
    ctx = jnp.einsum("bhqk,bhkd->bhqd", probs, vl)
    return ctx.transpose(0, 2, 1, 3).reshape(B, S, H)


if __name__ == "__main__":
    # Small config: batch=2, seq=8, hidden=32, heads=4 (head_dim=8)
    B, S, H, NH = 2, 8, 32, 4

    key = jax.random.PRNGKey(0)
    ks = jax.random.split(key, 8)
    init = lambda k, shape: (0.02 * jax.random.normal(k, shape)).astype(jnp.float32)

    params = {
        "wq": init(ks[0], (H, H)), "bq": init(ks[1], (H,)),
        "wk": init(ks[2], (H, H)), "bk": init(ks[3], (H,)),
        "wv": init(ks[4], (H, H)), "bv": init(ks[5], (H,)),
    }

    hidden_states = jax.random.normal(ks[6], (B, S, H), dtype=jnp.float32)
    # Additive attention mask, BERT-style: 0 for attend, -10000 for masked.
    pad = (jax.random.uniform(ks[7], (B, 1, 1, S)) < 0.25).astype(jnp.float32)
    attention_mask = pad * -10000.0

    prepared = prepare_params(params)                       # one-time weight prep
    out = bert_self_attention(hidden_states, attention_mask, prepared, NH)
    out = jax.block_until_ready(out)

    ref = reference_forward(hidden_states, attention_mask, params, NH)
    assert out.shape == (B, S, H)
    # bf16 MXU operands + approx reciprocal -> loosened tolerance vs f32 reference.
    assert jnp.allclose(out, ref, atol=5e-3, rtol=5e-3), "mismatch vs reference"

    print("KERNEL_OK")
</pallas_src>

<mosaic_0001>
module attributes {stable_mosaic.version = 11 : i64} {
  func.func @_qkv_proj_kernel(%arg0: i32, %arg1: i32, %arg2: memref<1x8x32xf32, #tpu.memory_space<vmem>>, %arg3: memref<32x96xbf16, #tpu.memory_space<vmem>>, %arg4: memref<1x96xf32, #tpu.memory_space<vmem>>, %arg5: memref<1x8x32xbf16, #tpu.memory_space<vmem>>, %arg6: memref<1x8x32xbf16, #tpu.memory_space<vmem>>, %arg7: memref<1x8x32xbf16, #tpu.memory_space<vmem>>) attributes {dimension_semantics = [#tpu.dimension_semantics<parallel>, #tpu.dimension_semantics<parallel>], iteration_bounds = array<i64: 2, 1>, scalar_prefetch = 0 : i64, scratch_operands = 0 : i64, tpu.core_type = #tpu.core_type<tc>, window_params = [{transform_indices = @transform_0, window_bounds = array<i64: 1, 8, 32>}, {pipeline_mode = #tpu.pipeline_mode<synchronous>, transform_indices = @transform_1, window_bounds = array<i64: 32, 96>}, {pipeline_mode = #tpu.pipeline_mode<synchronous>, transform_indices = @transform_2, window_bounds = array<i64: 1, 96>}, {transform_indices = @transform_3, window_bounds = array<i64: 1, 8, 32>}, {transform_indices = @transform_4, window_bounds = array<i64: 1, 8, 32>}, {transform_indices = @transform_5, window_bounds = array<i64: 1, 8, 32>}]} {
    %c0 = arith.constant 0 : index
    %c0_0 = arith.constant 0 : index
    %c0_1 = arith.constant 0 : index
    %0 = vector.load %arg2[%c0, %c0_0, %c0_1] : memref<1x8x32xf32, #tpu.memory_space<vmem>>, vector<1x8x32xf32>
    %1 = vector.shape_cast %0 : vector<1x8x32xf32> to vector<8x32xf32>
    %2 = arith.truncf %1 : vector<8x32xf32> to vector<8x32xbf16>
    %c0_2 = arith.constant 0 : index
    %c0_3 = arith.constant 0 : index
    %3 = vector.load %arg3[%c0_2, %c0_3] : memref<32x96xbf16, #tpu.memory_space<vmem>>, vector<32x96xbf16>
    %cst = arith.constant dense<0.000000e+00> : vector<8x96xf32>
    %4 = tpu.matmul %2, %3, %cst {dimension_numbers = #tpu.dot_dimension_numbers<[1], [0], [0], [1], [0, 0, 1, 1], [], []>} : vector<8x32xbf16>, vector<32x96xbf16>, vector<8x96xf32> -> vector<8x96xf32>
    %c0_4 = arith.constant 0 : index
    %c0_5 = arith.constant 0 : index
    %5 = vector.load %arg4[%c0_4, %c0_5] : memref<1x96xf32, #tpu.memory_space<vmem>>, vector<1x96xf32>
    %6 = vector.broadcast %5 : vector<1x96xf32> to vector<8x96xf32>
    %7 = arith.addf %4, %6 : vector<8x96xf32>
    %8 = vector.extract_strided_slice %7 {offsets = [0, 0], sizes = [8, 32], strides = [1, 1]} : vector<8x96xf32> to vector<8x32xf32>
    %9 = arith.truncf %8 : vector<8x32xf32> to vector<8x32xbf16>
    %c0_6 = arith.constant 0 : index
    %c0_7 = arith.constant 0 : index
    %c0_8 = arith.constant 0 : index
    %10 = vector.load %arg5[%c0_6, %c0_7, %c0_8] : memref<1x8x32xbf16, #tpu.memory_space<vmem>>, vector<1x8x32xbf16>
    %11 = vector.shape_cast %10 : vector<1x8x32xbf16> to vector<8x32xbf16>
    %12 = vector.shape_cast %9 : vector<8x32xbf16> to vector<1x8x32xbf16>
    tpu.vector_store %arg5[%c0_6, %c0_7, %c0_8], %12 {strides = array<i32>} : memref<1x8x32xbf16, #tpu.memory_space<vmem>>, vector<1x8x32xbf16>,
    %13 = vector.extract_strided_slice %7 {offsets = [0, 32], sizes = [8, 32], strides = [1, 1]} : vector<8x96xf32> to vector<8x32xf32>
    %14 = arith.truncf %13 : vector<8x32xf32> to vector<8x32xbf16>
    %c0_9 = arith.constant 0 : index
    %c0_10 = arith.constant 0 : index
    %c0_11 = arith.constant 0 : index
    %15 = vector.load %arg6[%c0_9, %c0_10, %c0_11] : memref<1x8x32xbf16, #tpu.memory_space<vmem>>, vector<1x8x32xbf16>
    %16 = vector.shape_cast %15 : vector<1x8x32xbf16> to vector<8x32xbf16>
    %17 = vector.shape_cast %14 : vector<8x32xbf16> to vector<1x8x32xbf16>
    tpu.vector_store %arg6[%c0_9, %c0_10, %c0_11], %17 {strides = array<i32>} : memref<1x8x32xbf16, #tpu.memory_space<vmem>>, vector<1x8x32xbf16>,
    %18 = vector.extract_strided_slice %7 {offsets = [0, 64], sizes = [8, 32], strides = [1, 1]} : vector<8x96xf32> to vector<8x32xf32>
    %19 = arith.truncf %18 : vector<8x32xf32> to vector<8x32xbf16>
    %c0_12 = arith.constant 0 : index
    %c0_13 = arith.constant 0 : index
    %c0_14 = arith.constant 0 : index
    %20 = vector.load %arg7[%c0_12, %c0_13, %c0_14] : memref<1x8x32xbf16, #tpu.memory_space<vmem>>, vector<1x8x32xbf16>
    %21 = vector.shape_cast %20 : vector<1x8x32xbf16> to vector<8x32xbf16>
    %22 = vector.shape_cast %19 : vector<8x32xbf16> to vector<1x8x32xbf16>
    tpu.vector_store %arg7[%c0_12, %c0_13, %c0_14], %22 {strides = array<i32>} : memref<1x8x32xbf16, #tpu.memory_space<vmem>>, vector<1x8x32xbf16>,
    return
  }
  func.func @transform_0(%arg0: i32, %arg1: i32) -> (i32, i32, i32) {
    %c0_i32 = arith.constant 0 : i32
    %c0_i32_0 = arith.constant 0 : i32
    return %arg0, %arg1, %c0_i32 : i32, i32, i32
  }
  func.func @transform_1(%arg0: i32, %arg1: i32) -> (i32, i32) {
    %c0_i32 = arith.constant 0 : i32
    %c0_i32_0 = arith.constant 0 : i32
    %c0_i32_1 = arith.constant 0 : i32
    return %c0_i32, %c0_i32_0 : i32, i32
  }
  func.func @transform_2(%arg0: i32, %arg1: i32) -> (i32, i32) {
    %c0_i32 = arith.constant 0 : i32
    %c0_i32_0 = arith.constant 0 : i32
    %c0_i32_1 = arith.constant 0 : i32
    return %c0_i32, %c0_i32_0 : i32, i32
  }
  func.func @transform_3(%arg0: i32, %arg1: i32) -> (i32, i32, i32) {
    %c0_i32 = arith.constant 0 : i32
    %c0_i32_0 = arith.constant 0 : i32
    return %arg0, %arg1, %c0_i32 : i32, i32, i32
  }
  func.func @transform_4(%arg0: i32, %arg1: i32) -> (i32, i32, i32) {
    %c0_i32 = arith.constant 0 : i32
    %c0_i32_0 = arith.constant 0 : i32
    return %arg0, %arg1, %c0_i32 : i32, i32, i32
  }
  func.func @transform_5(%arg0: i32, %arg1: i32) -> (i32, i32, i32) {
    %c0_i32 = arith.constant 0 : i32
    %c0_i32_0 = arith.constant 0 : i32
    return %arg0, %arg1, %c0_i32 : i32, i32, i32
  }
}

</mosaic_0001>

<bundles_post_ra>
// kernel: tpu_custom_call.1
= control target key start
LH: loop header
LB: loop body
LE: loop exit
PB: predicated region body
PF: predicated region fallthrough
CT: control target
= control target key end

     0   :  { %s1197_s0 = inlined_call_operand.hbm [shape: f32[2,8,32], index: 0, kind: input, shape index: {}]   ;;  %s1198_s1 = inlined_call_operand.hbm [shape: bf16[32,96], index: 1, kind: input, shape index: {}]   ;;  %s1199_s2 = inlined_call_operand.vmem [shape: f32[1,96], index: 2, kind: input, shape index: {}]   ;;  %s1200_s3 = inlined_call_operand.hbm [shape: bf16[2,8,32], index: 3, kind: output, shape index: {0}]   ;;  %s1201_s4 = inlined_call_operand.hbm [shape: bf16[2,8,32], index: 4, kind: output, shape index: {1}]   ;;  %s1202_s5 = inlined_call_operand.hbm [shape: bf16[2,8,32], index: 5, kind: output, shape index: {2}]  }
   0x1   :  { %1206 = sst [smem:[#allocation16_spill]] %s1198_s1 }
   0x2   :  { %11 = vsyncpa [#allocation3], 0 }
   0x3   :  { %13 = vsyncpa [#allocation3 + $0x1], 0 }
   0x4   :  { %14 = vsyncpa [#allocation6], 0 }
   0x5   :  { %15 = vsyncpa [#allocation4], 0 }
   0x6   :  { %17 = vsyncpa [#allocation4 + $0x1], 0 }
   0x7   :  { %18 = vsyncpa [#allocation9], 0 }
   0x8   :  { %20 = vsyncpa [#allocation9 + $0x1], 0  ;;  %s950_s18 = smov 0   ;;  %s952_s19 = smov 0  }
   0x9   :  { %s954_s20 = smov 0   ;;  %s956_s21 = smov 0  }
   0xa   :  { %s958_s22 = smov 0   ;;  %s960_s23 = smov 0  }
   0xb LB: > { %s981_s24 = sadd.s32 4294967295, %s907_s23   ;;  %s1203_s25 = sadd.s32 4294967294, %s907_s23   ;;  %s907_s23 = sphi %s960_s23, %s26_s23   ;;  %s903_s22 = sphi %s958_s22, %s1227_s22   ;;  %s899_s21 = sphi %s956_s21, %s1226_s21   ;;  %s895_s20 = sphi %s954_s20, %s1225_s20   ;;  %s891_s19 = sphi %s952_s19, %s1224_s19   ;;  %s887_s18 = sphi %s950_s18, %s1223_s18  }
   0xc   : > { %p60_p0 = scmp.ne.s32.totalorder %s891_s19, %s887_s18  ;;  %p1205_p1 = scmp.eq.s32.totalorder %s981_s24, 0 }
   0xd   : > { %p134_p3 = scmp.eq.s32.totalorder %s1203_s25, 1  ;;  %p586_p5 = scmp.ge.s32.totalorder %s907_s23, 1 }
   0xe   : > { %p992_p4 = por %p1205_p1, %p60_p0  ;;  %p197_p7 = scmp.lt.s32.totalorder %s907_s23, 3 }
   0xf   : > { %p997_p6 = por %p134_p3, %p60_p0  ;;  %s909_s29 = smov [#allocation5]  }
  0x10   : > { %p1002_p8 = pnand %p586_p5, %p197_p7  ;;  %s209_s30 = sshll.u32 %s909_s29, 4  ;;  %s210_s30 = int_to_ptr.vmem [resolvable:$true] %s209_s30 }
  0x11   : > { %s1208_s27 = scalar_select %p997_p6, 1, 0 }
  0x12   : > { %p634_p9 = pneg %p1002_p8  ;;  %s38_s7 = sadd.s32 1, %s903_s22 }
  0x13   : > { %s724_s8 = scalar_lea.vmem %s210_s30, 256  ;;  %p732_p5 = scmp.lt.s32.totalorder %s210_s30, %s210_s30 }
  0x14   : > { %p1011_p11 = pnand %p634_p9, %p1205_p1  ;;  %p725_p13 = scmp.ne.s32.totalorder %s210_s30, %s724_s8 }
  0x15   : > { %p733_p7 = scmp.lt.s32.totalorder %s724_s8, %s724_s8 }
  0x16   : > { %p715_p12 = pneg %p1011_p11 }
  0x17   : > { %p734_p2 = por %p733_p7, %p732_p5 }
  0x18   : > { %p727_p0 = pnand %p725_p13, %p715_p12 }
  0x1a   : > { %p728_p3 = pneg %p727_p0 }
  0x1c   : > { %p735_p6 = pnand %p734_p2, %p728_p3 }
  0x1e   : > { %738 = shalt.err (!%p735_p6)
}
  0x1f   : > { %s910_s9 = smov 64   ;;  %s911_s10 = smov 4  }
  0x20   : > { %s1211_s1 = sld [smem:[#allocation16_spill]]  ;;  %p40_p2 = scmp.ge.s32.totalorder %s38_s7, 2 }
  0x21   : > { %s47_s13 = sadd.s32 1, %s895_s20  ;;  %p54_p6 = scmp.ne.s32.totalorder %s895_s20, %s891_s19 }
  0x22   : > { %p55_p9 = scmp.eq.s32.totalorder %s907_s23, 0  ;;  %s1229_s7 = smov (%p40_p2, %s38_s7), 0 }
  0x23   : > { %1212 = sst [smem:[#allocation15_spill]] %s1229_s7  ;;  %p1214_p13 = scmp.eq.s32.totalorder %s981_s24, 1 }
  0x24   : > { %p1029_p12 = por %p55_p9, %p54_p6  ;;  %s42_s16 = ssub.s32 %s903_s22, %s1229_s7 }
  0x25   : > { %p1035_p0 = por %p1214_p13, %p54_p6  ;;  %p653_p3 = scmp.lt.s32.totalorder %s907_s23, 2 }
  0x26   : > { %637 = dma.hbm_to_vmem [thread:$0]  (!%p1011_p11), %s1211_s1, 256, %s210_s30, [#allocation6], %s910_s9, %s910_s9, %s911_s10  }
  0x27   : > { %p45_p11 = scmp.eq.s32.totalorder %s42_s16, 0  ;;  %s226_s17 = sand.u32 1, %s895_s20  }
  0x28   : > { %s589_s29 = sshll.u32 %s226_s17, 3  ;;  %s590_s6 = sshll.u32 %s903_s22, 7 }
  0x29   : > { %s1044_s30 = scalar_select %p45_p11, %s895_s20, %s47_s13  }
  0x2a   : > { %s236_s10 = scalar_lea.hbm %s1197_s0, %s590_s6  ;;  %s230_s11 = scalar_lea.vmem [#allocation2], %s589_s29 }
  0x2b   : > { %s238_s12 = sshll.u32 %s230_s11, 4  ;;  %p1052_p5 = pnand %p653_p3, %p1029_p12  ;;  %s239_s12 = int_to_ptr.vmem [resolvable:$true] %s238_s12 }
  0x2c   : > { %s227_s1 = scalar_lea.sflag [#allocation3], %s226_s17  ;;  %s752_s16 = scalar_lea.vmem %s239_s12, 128 }
  0x2d   : > { %p741_p7 = pneg %p1052_p5  ;;  %p753_p2 = scmp.ne.s32.totalorder %s239_s12, %s752_s16 }
  0x2e   : > { %s912_s13 = smov [#allocation2]  }
  0x2f   : > { %p755_p6 = pnand %p753_p2, %p741_p7  ;;  %s757_s7 = sshll.u32 %s912_s13, 4  ;;  %s758_s7 = int_to_ptr.vmem [resolvable:$false] %s757_s7 }
  0x30   : > { %s759_s6 = scalar_lea.vmem %s758_s7, 256  ;;  %p760_p13 = scmp.lt.s32.totalorder %s239_s12, %s758_s7 }
  0x31   : > { %p756_p9 = pneg %p755_p6  ;;  %p761_p11 = scmp.lt.s32.totalorder %s759_s6, %s752_s16 }
  0x33   : > { %p762_p10 = por %p761_p11, %p760_p13 }
  0x35   : > { %p763_p1 = pnand %p762_p10, %p756_p9 }
  0x37   : > { %766 = shalt.err (!%p763_p1)
}
  0x38   : > { %641 = dma.hbm_to_vmem [thread:$0]  (!%p1052_p5), %s236_s10, 128, %s239_s12, %s227_s1  }
  0x39   : > { %247 = sbr.rel (%p1002_p8) target bundleno = 422 (0x1a6), region = 32  ;;  %s1063_s14 = sand.u32 (!%p1002_p8), 1, %s891_s19  }
  0x3a   : > { %s592_s17 = sshll.u32 (!%p1002_p8), %s1063_s14, 3  ;;  %s250_s29 = scalar_lea.sflag (!%p1002_p8), [#allocation3], %s1063_s14 }
  0x3b   : > { %s253_s8 = scalar_lea.vmem (!%p1002_p8), [#allocation2], %s592_s17 }
  0x3e   : > { %870 = dma.done.wait (%p992_p4), %s250_s29, 128  }
  0x3f   : > { %872 = vsyncadd (%p992_p4), %s250_s29, 4294967168  ;;  %p1217_p1 = scmp.eq.s32.totalorder %s981_s24, 0 }
  0x41   : > { %874 = dma.done.wait (%p1217_p1), [#allocation6], 256   ;;  %p1218_p10 = pmov %p1217_p1 }
  0x42   : > { %v913_v0 = vmov 0.0   ;;  %vm914_vm0 = vmmov 0   ;;  %v711_v1 = vld [vmem:[#allocation5 + $0x8] sm:$0xff]   ;;  %v712_v2 = vld [vmem:[#allocation5] sm:$0xff]   ;;  %v295_v3 = vld [vmem:[%s253_s8] sm:$0xff]  ;;  %vm320_vm1 = vcmask 261120  }
  0x43   : > { %876 = vsyncadd (%p1218_p10), [#allocation6], 4294967040  ;;  %614 = vmatprep.subr.bf16.mxu0 %v913_v0  ;;  %618 = vmatprep.mubr.msk.bf16.mxu0 %vm914_vm0, %v913_v0  ;;  %v296_v4 = vpack.c.bf16 %v295_v3, %v295_v3  ;;  %s1076_s1 = sshll.u32 %s1063_s14, 2  ;;  %v597_v5 = vld [vmem:[%s1199_s2] ss:$0 sm:$0xff]  ;;  %s1082_s28 = sshll.u32 %s899_s21, 6 }
  0x44   : > { %615 = vmatpush3.bf16.msra.mxu0 %v711_v1  ;;  %s279_s7 = scalar_lea.vmem [#allocation7], %s1076_s1  ;;  %vm365_vm2 = vcmask 257024   ;;  %s1089_s12 = scalar_lea.hbm %s1200_s3, %s1082_s28 }
  0x45   : > { %616 = vmatprep.subr.bf16.mxu0 %v913_v0  ;;  %s403_s9 = sshll.u32 %s279_s7, 4  ;;  %s915_s21 = smov 96   ;;  %s1091_s9 = int_to_ptr.vmem [resolvable:$true] %s403_s9 }
  0x46   : > { %s379_s16 = scalar_lea.sflag [#allocation4], %s1063_s14  ;;  %s767_s13 = scalar_lea.vmem %s1091_s9, 64 }
  0x47   : > { %p768_p4 = scmp.ne.s32.totalorder %s1091_s9, %s767_s13  ;;  %s916_s6 = smov [#allocation7]  }
  0x48   : > { %617 = vmatpush3.bf16.msra.mxu0 %v712_v2  ;;  %s771_s17 = sshll.u32 %s916_s6, 4  ;;  %s772_s17 = int_to_ptr.vmem [resolvable:$false] %s771_s17 }
  0x49   : > { %p769_p8 = pnand %p768_p4, %p1035_p0  ;;  %s773_s29 = scalar_lea.vmem %s772_s17, 128 }
  0x4a   : > { %p774_p3 = scmp.lt.s32.totalorder %s1091_s9, %s772_s17  ;;  %p775_p5 = scmp.lt.s32.totalorder %s773_s29, %s767_s13 }
  0x4b   : > { %619 = vmatmul.mubr.msk.bf16.vlgmr.msra.gmra.mxu0 %vm320_vm1, %v296_v4  ;;  %p770_p12 = pneg %p769_p8 }
  0x4c   : > { %p776_p7 = por %p775_p5, %p774_p3 }
  0x4e   : > { %p777_p2 = pnand %p776_p7, %p770_p12 }
 0x10b   : > { %v358_v6 = vpop.f32.mrf.mxu0 }
 0x10c   : > { %v359_v7 = vadd.f32 %v597_v5, %v358_v6 }
 0x10d   : > { %v620_v8 = vpop.f32.mrf.mxu0 }
 0x10e   : > { %v364_v9 = vpack.c.bf16 %v359_v7, %v359_v7 }
 0x10f   : > { %v361_v10 = vpop.f32.mrf.mxu0 }
 0x110   : > { %370 = vrot.lane.b32.xlu0 %v364_v9, %s915_s21  ;;  %366 = vst.msk [vmem:[%s279_s7] sm:$0xf] %vm365_vm2, %v364_v9 }
 0x111   : > { %v621_v11 = vpop.f32.mrf.mxu0 }
 0x112   : > { %780 = shalt.err (!%p777_p2)
}
 0x113   : > { %s781_s8 = scalar_lea.hbm %s1089_s12, 64  ;;  %s785_s26 = scalar_lea.hbm %s1200_s3, 128 }
 0x114   : > { %p782_p6 = scmp.ne.s32.totalorder %s1089_s12, %s781_s8  ;;  %p786_p11 = scmp.lt.s32.totalorder %s1089_s12, %s1200_s3 }
 0x115   : > { %p787_p1 = scmp.lt.s32.totalorder %s785_s26, %s781_s8 }
 0x116   : > { %p783_p9 = pnand %p782_p6, %p1035_p0 }
 0x117   : > { %p788_p10 = por %p787_p1, %p786_p11 }
 0x118   : > { %p784_p13 = pneg %p783_p9 }
 0x11a   : > { %p789_p4 = pnand %p788_p10, %p784_p13 }
 0x11c   : > { %792 = shalt.err (!%p789_p4)
}
 0x11d   : > { %628 = dma.vmem_to_hbm [thread:$0]  (%p1035_p0), %s1091_s9, 64, %s1089_s12, %s379_s16  }
 0x11e   : > { %s917_s11 = smov 64   ;;  %s383_s21 = sand.u32 1, %s981_s24  }
 0x11f   : > { %374 = vrot.lane.b32.xlu0 %v364_v9, %s917_s11  ;;  %s286_s13 = scalar_lea.vmem [#allocation8], %s1076_s1  ;;  %s1121_s8 = scalar_lea.hbm %s1201_s4, %s1082_s28 }
 0x120   : > { %s417_s6 = sshll.u32 %s286_s13, 4  ;;  %s293_s14 = scalar_lea.vmem [#allocation10], %s1076_s1  ;;  %s1123_s6 = int_to_ptr.vmem [resolvable:$true] %s417_s6 }
 0x121   : > { %s431_s25 = sshll.u32 %s293_s14, 4  ;;  %s1129_s9 = scalar_lea.sflag [#allocation9], %s383_s21  ;;  %s432_s25 = int_to_ptr.vmem [resolvable:$true] %s431_s25 }
 0x122   : > { %s793_s24 = scalar_lea.vmem %s1123_s6, 64  ;;  %s918_s12 = smov [#allocation8]  }
 0x123   : > { %p794_p8 = scmp.ne.s32.totalorder %s1123_s6, %s793_s24  ;;  %s797_s16 = sshll.u32 %s918_s12, 4  ;;  %s798_s16 = int_to_ptr.vmem [resolvable:$false] %s797_s16 }
 0x124   : > { %s799_s26 = scalar_lea.vmem %s798_s16, 128  ;;  %p800_p5 = scmp.lt.s32.totalorder %s1123_s6, %s798_s16 }
 0x125   : > { %p795_p12 = pnand %p794_p8, %p1035_p0  ;;  %p801_p7 = scmp.lt.s32.totalorder %s799_s26, %s793_s24 }
 0x127   : > { %p796_p3 = pneg %p795_p12  ;;  %p802_p2 = por %p801_p7, %p800_p5 }
 0x129   : > { %p803_p6 = pnand %p802_p2, %p796_p3 }
 0x182   : > { %v371_v12 = vpop.permute.xlu0 %370 }
 0x183   : > { %373 = vst.msk [vmem:[%s286_s13] sm:$0xf] %vm365_vm2, %v371_v12 }
 0x184   : > { %806 = shalt.err (!%p803_p6)
}
 0x185   : > { %s807_s7 = scalar_lea.hbm %s1121_s8, 64  ;;  %s811_s21 = scalar_lea.hbm %s1201_s4, 128 }
 0x186   : > { %p808_p9 = scmp.ne.s32.totalorder %s1121_s8, %s807_s7  ;;  %p812_p1 = scmp.lt.s32.totalorder %s1121_s8, %s1201_s4 }
 0x187   : > { %p813_p10 = scmp.lt.s32.totalorder %s811_s21, %s807_s7 }
 0x188   : > { %p809_p13 = pnand %p808_p9, %p1035_p0 }
 0x189   : > { %p814_p4 = por %p813_p10, %p812_p1 }
 0x18a   : > { %p810_p11 = pneg %p809_p13 }
 0x18c   : > { %p815_p8 = pnand %p814_p4, %p810_p11 }
 0x18e   : > { %818 = shalt.err (!%p815_p8)
}
 0x18f   : > { %629 = dma.vmem_to_hbm [thread:$0]  (%p1035_p0), %s1123_s6, 64, %s1121_s8, %s1129_s9  }
 0x190   : > { %s429_s12 = scalar_lea.hbm %s1202_s5, %s1082_s28  ;;  %s819_s16 = scalar_lea.vmem %s432_s25, 64 }
 0x191   : > { %v375_v13 = vpop.permute.xlu0 %374  ;;  %p820_p12 = scmp.ne.s32.totalorder %s432_s25, %s819_s16  ;;  %s919_s26 = smov [#allocation10]  }
 0x192   : > { %377 = vst.msk [vmem:[%s293_s14] sm:$0xf] %vm365_vm2, %v375_v13  ;;  %s823_s7 = sshll.u32 %s919_s26, 4  ;;  %s824_s7 = int_to_ptr.vmem [resolvable:$false] %s823_s7 }
 0x193   : > { %p821_p3 = pnand %p820_p12, %p1035_p0  ;;  %s825_s10 = scalar_lea.vmem %s824_s7, 128 }
 0x194   : > { %p826_p7 = scmp.lt.s32.totalorder %s432_s25, %s824_s7  ;;  %p827_p2 = scmp.lt.s32.totalorder %s825_s10, %s819_s16 }
 0x195   : > { %p822_p5 = pneg %p821_p3 }
 0x196   : > { %p828_p6 = por %p827_p2, %p826_p7 }
 0x198   : > { %p829_p9 = pnand %p828_p6, %p822_p5 }
 0x19a   : > { %832 = shalt.err (!%p829_p9)
}
 0x19b   : > { %s833_s28 = scalar_lea.hbm %s429_s12, 64  ;;  %s837_s8 = scalar_lea.hbm %s1202_s5, 128 }
 0x19c   : > { %p834_p13 = scmp.ne.s32.totalorder %s429_s12, %s833_s28  ;;  %p838_p10 = scmp.lt.s32.totalorder %s429_s12, %s1202_s5 }
 0x19d   : > { %p839_p4 = scmp.lt.s32.totalorder %s837_s8, %s833_s28 }
 0x19e   : > { %p835_p11 = pnand %p834_p13, %p1035_p0 }
 0x19f   : > { %p840_p8 = por %p839_p4, %p838_p10 }
 0x1a0   : > { %p836_p1 = pneg %p835_p11 }
 0x1a2   : > { %p841_p12 = pnand %p840_p8, %p836_p1 }
 0x1a4   : > { %844 = shalt.err (!%p841_p12)
}
 0x1a5   : > { %630 = dma.vmem_to_hbm [thread:$0]  (%p1035_p0), %s432_s25, 64, %s429_s12, %s1129_s9  }
 0x1a6 PF: > { %s443_s21 = sand.u32 1, %s887_s18   ;;  %p1219_p3 = scmp.ne.s32.totalorder %s1208_s27, 0 }
 0x1a7   : > { %p1220_p5 = scmp.ge.s32.totalorder %s907_s23, 2  ;;  %s444_s13 = scalar_lea.sflag [#allocation4], %s443_s21 }
 0x1a9   : > { %p643_p7 = pnand %p1220_p5, %p1219_p3 }
 0x1ab   : > { %p644_p2 = pneg %p643_p7 }
 0x1ad   : > { %878 = dma.done.wait (%p644_p2), %s444_s13, 64  }
 0x1ae   : > { %880 = vsyncadd (%p644_p2), %s444_s13, 4294967232  ;;  %s1221_s17 = sadd.s32 4294967294, %s907_s23  }
 0x1af   : > { %s452_s29 = sand.u32 1, %s1221_s17  }
 0x1b0   : > { %s453_s24 = scalar_lea.sflag [#allocation9], %s452_s29 }
 0x1b1   : > { %882 = dma.done.wait (%p644_p2), %s453_s24, 128  }
 0x1b2   : > { %884 = vsyncadd (%p644_p2), %s453_s24, 4294967168  ;;  %s26_s23 = sadd.s32 1, %s907_s23   ;;  %s1222_s27 = sld [smem:[#allocation15_spill]] }
 0x1b3   : > { %p23_p0 = scmp.ge.s32.totalorder %s26_s23, 4   ;;  %s1223_s18 = smov %s891_s19 }
 0x1b4   : > { %s1224_s19 = smov %s895_s20  ;;  %s1225_s20 = smov %s1044_s30 }
 0x1b5   : > { %s1226_s21 = smov %s903_s22  ;;  %25 = sbr.rel (!%p23_p0) target bundleno = 11 (0xb), region = 113 }
 0x1b8   : > { %s1227_s22 = smov %s1222_s27 }
 0x1ba   :  { %467 = vsyncpa [#allocation3], 1 }
 0x1bb   :  { %469 = vsyncpa [#allocation3 + $0x1], 1 }
 0x1bc   :  { %470 = vsyncpa [#allocation6], 1 }
 0x1bd   :  { %471 = vsyncpa [#allocation4], 1 }
 0x1be   :  { %473 = vsyncpa [#allocation4 + $0x1], 1 }
 0x1bf   :  { %474 = vsyncpa [#allocation9], 1 }
 0x1c0   :  { %476 = vsyncpa [#allocation9 + $0x1], 1 }

</bundles_post_ra>
